<compile_context>
chip_gen: v5e
topology: v5e:2x2
jax: 0.10.0
libtpu: 0.0.40
codegen_flags: <defaults>
</compile_context>

<pallas_src>
import jax
import jax.numpy as jnp
from jax.experimental import pallas as pl
from jax.experimental.pallas import tpu as pltpu

_LANE = 128
# ~2 MiB blocks: >= ~85% of HBM roofline on v6e for a streaming copy;
# 2 buffers x (in + out) = 8 MiB, under v5e's 16 MiB scoped default and well
# under v7x's 64 MiB physical VMEM (shared between its 2 TensorCores).
_BLOCK_BUDGET_BYTES = 2 * 1024 * 1024
# Explicit, generation-safe cap (== v6e/v7x scoped default, < physical on all).
_VMEM_LIMIT_BYTES = 32 * 1024 * 1024


def _copy_kernel(x_ref, o_ref):
    # Lane-dense 2D tile copy: pure full-width vld/vst, no relayout.
    o_ref[...] = x_ref[...]


def _sublane_quantum(itemsize: int) -> int:
    # Sub-32-bit dtypes pack along sublanes: one vreg holds 8 rows of f32,
    # 16 rows of bf16, 32 rows of int8.
    return {4: 8, 2: 16, 1: 32}.get(itemsize, 8)


def _best_slab(total: int, sublane_q: int):
    """Dense (rows, cols) view of `total` contiguous elements: cols a multiple
    of 128 (lane-dense), rows a multiple of the sublane quantum if possible.
    Returns None when total is not 128-divisible."""
    fallback = None
    for cols in (2048, 1024, 512, 256, 128):
        if total % cols:
            continue
        rows = total // cols
        if rows % sublane_q == 0:
            return rows, cols
        fallback = (rows, cols)  # descending cols -> last kept has the most rows
    return fallback


def _choose_tiles(rows: int, cols: int, itemsize: int, sublane_q: int):
    """Pick (row_tile, col_tile) for a lane-dense streaming copy.

    * col_tile: full last dim whenever one row fits the budget (no masked
      lane-remainder stores); otherwise a 128-multiple chunk.
    * row_tile: as many rows as fit the block budget, rounded to the
      dtype-dependent sublane quantum; split when that would leave only one
      block on the leading grid axis (v7x core split).
    """
    budget = _BLOCK_BUDGET_BYTES
    row_bytes = cols * itemsize

    if row_bytes <= budget or cols < _LANE:
        n_tile = cols
    else:
        n_tile = min(8192, (cols // _LANE) * _LANE)

    max_rows = max(1, budget // max(1, n_tile * itemsize))
    if rows <= max_rows:
        b_tile = rows
    else:
        b_tile = max(sublane_q, (max_rows // sublane_q) * sublane_q)
        b_tile = min(b_tile, rows)

    # Give the leading (core-parallel) grid axis at least 2 blocks when the
    # row count allows a clean sublane-aligned split (helps v7x's 2 TCs; costs
    # one extra ~0.35 us grid step on single-TC v5e/v6e — negligible).
    if (rows + b_tile - 1) // b_tile == 1 and rows >= 2 * sublane_q:
        half = (rows + 1) // 2
        half = ((half + sublane_q - 1) // sublane_q) * sublane_q
        if half < rows:
            b_tile = half

    return b_tile, n_tile


@jax.jit
def flattener(x: jax.Array) -> jax.Array:
    """Pallas equivalent of Flattener.forward: (B, ...) -> (B, prod(...))."""
    b = x.shape[0]
    flat = 1
    for d in x.shape[1:]:
        flat *= d
    total = b * flat

    # Degenerate (zero-element) case: nothing to copy.
    if total == 0:
        return jnp.reshape(x, (b, flat))

    itemsize = jnp.dtype(x.dtype).itemsize
    sublane_q = _sublane_quantum(itemsize)

    # Zero-cost metadata reshape in the wrapper. If the natural (b, flat) view
    # is sublane-/lane-sparse, present a denser slab instead (same contiguous
    # element order), run the copy on it, and reshape the output back.
    view = (b, flat)
    if b % sublane_q != 0 or flat % _LANE != 0:
        slab = _best_slab(total, sublane_q)
        if slab is not None:
            view = slab
    rows, cols = view

    x2 = x.reshape(rows, cols)

    b_tile, n_tile = _choose_tiles(rows, cols, itemsize, sublane_q)
    grid_r = (rows + b_tile - 1) // b_tile
    grid_c = (cols + n_tile - 1) // n_tile

    # Put the axis with >= 2 blocks first so v7x's two TensorCores both get work.
    if grid_r == 1 and grid_c > 1:
        grid = (grid_c, grid_r)
        index_map = lambda j, i: (i, j)
    else:
        grid = (grid_r, grid_c)
        index_map = lambda i, j: (i, j)

    y2 = pl.pallas_call(
        _copy_kernel,
        out_shape=jax.ShapeDtypeStruct((rows, cols), x.dtype),
        grid=grid,
        in_specs=[pl.BlockSpec((b_tile, n_tile), index_map)],
        out_specs=pl.BlockSpec((b_tile, n_tile), index_map),
        # Output bytes are identical to input bytes: let XLA reuse the input
        # HBM buffer for the output when the producer value is dead.
        input_output_aliases={0: 0},
        # Pure memory traffic; help XLA schedule/overlap it sensibly.
        cost_estimate=pl.CostEstimate(
            flops=0, transcendentals=0, bytes_accessed=2 * total * itemsize),
        compiler_params=pltpu.CompilerParams(
            dimension_semantics=("parallel", "parallel"),
            vmem_limit_bytes=_VMEM_LIMIT_BYTES,
        ),
    )(x2)

    return y2.reshape(b, flat)


if __name__ == "__main__":
    key = jax.random.PRNGKey(0)
    # Small NCHW feature-map shape consistent with the module's typical use.
    B, C, H, W = 2, 4, 16, 16
    x = jax.random.normal(key, (B, C, H, W), dtype=jnp.float32)

    y = flattener(x)
    jax.block_until_ready(y)

    # Correctness check against the plain-JAX reference (== torch semantics).
    y_ref = x.reshape(B, -1)
    assert y.shape == (B, C * H * W), y.shape
    assert y.dtype == x.dtype
    assert jnp.array_equal(y, y_ref), "flatten mismatch"

    print("KERNEL_OK")
</pallas_src>

<mosaic_0001>
module attributes {stable_mosaic.version = 11 : i64} {
  func.func @_copy_kernel(%arg0: i32, %arg1: i32, %arg2: memref<8x256xf32, #tpu.memory_space<vmem>>, %arg3: memref<8x256xf32, #tpu.memory_space<vmem>>) attributes {dimension_semantics = [#tpu.dimension_semantics<parallel>, #tpu.dimension_semantics<parallel>], iteration_bounds = array<i64: 1, 1>, scalar_prefetch = 0 : i64, scratch_operands = 0 : i64, tpu.core_type = #tpu.core_type<tc>, window_params = [{transform_indices = @transform_0, window_bounds = array<i64: 8, 256>}, {transform_indices = @transform_1, window_bounds = array<i64: 8, 256>}]} {
    %c0 = arith.constant 0 : index
    %c0_0 = arith.constant 0 : index
    %0 = vector.load %arg2[%c0, %c0_0] : memref<8x256xf32, #tpu.memory_space<vmem>>, vector<8x256xf32>
    %c0_1 = arith.constant 0 : index
    %c0_2 = arith.constant 0 : index
    %1 = vector.load %arg3[%c0_1, %c0_2] : memref<8x256xf32, #tpu.memory_space<vmem>>, vector<8x256xf32>
    tpu.vector_store %arg3[%c0_1, %c0_2], %0 {strides = array<i32>} : memref<8x256xf32, #tpu.memory_space<vmem>>, vector<8x256xf32>,
    return
  }
  func.func @transform_0(%arg0: i32, %arg1: i32) -> (i32, i32) {
    %c0_i32 = arith.constant 0 : i32
    return %arg0, %arg1 : i32, i32
  }
  func.func @transform_1(%arg0: i32, %arg1: i32) -> (i32, i32) {
    %c0_i32 = arith.constant 0 : i32
    return %arg0, %arg1 : i32, i32
  }
}

</mosaic_0001>

<bundles_post_ra>
// kernel: flattener.1
= control target key start
LH: loop header
LB: loop body
LE: loop exit
PB: predicated region body
PF: predicated region fallthrough
CT: control target
= control target key end

     0   :  { %s38_s0 = inlined_call_operand.vmem [shape: f32[8,256], index: 0, kind: input, shape index: {}, may-alias: {0,1}]   ;;  %s39_s1 = inlined_call_operand.vmem [shape: f32[8,256], index: 1, kind: output, shape index: {}, may-alias: {0,1}]  }
   0x1   :  { %v8_v0 = vld [vmem:[%s38_s0] sm:$0xff]  ;;  %v9_v1 = vld [vmem:[%s38_s0 + $0x8] sm:$0xff] }
   0x2   :  { %10 = vst [vmem:[%s39_s1] sm:$0xff] %v8_v0 }
   0x3   :  { %11 = vst [vmem:[%s39_s1 + $0x8] sm:$0xff] %v9_v1 }

</bundles_post_ra>
